<compile_context>
chip_gen: v7x
topology: tpu7x:2x2x1
jax: 0.10.0
libtpu: 0.0.40
codegen_flags: <defaults>
</compile_context>

<pallas_src>
import functools

import jax
import jax.numpy as jnp
from jax.experimental import pallas as pl
from jax.experimental.pallas import tpu as pltpu

# Logical (PyTorch) dims and lane-padded dims.
IN_DIM, H1, H2, H3, OUT_DIM = 110, 400, 100, 25, 7
IN_PAD, H1_PAD, H2_PAD, H3_PAD = 128, 512, 128, 128
OUT_STORE = 8                      # narrow output: 7 real classes + 1 pad lane
NEG_BIG = -1e30                    # finite sentinel (avoid inf-inf -> NaN)


def _round_up(n, m):
    return ((n + m - 1) // m) * m


def mlp_kernel(x_ref, w1_ref, b1_ref, w2_ref, b2_ref,
               w3_ref, b3_ref, w4_ref, b4_ref, o_ref):
    # Layer 1: bf16 operands (x already bf16), f32 accumulate; bias/ReLU in f32.
    h1 = jnp.dot(x_ref[...], w1_ref[...], preferred_element_type=jnp.float32)
    h1 = jnp.maximum(h1 + b1_ref[...], 0.0)
    # Layer 2
    h2 = jnp.dot(h1.astype(jnp.bfloat16), w2_ref[...],
                 preferred_element_type=jnp.float32)
    h2 = jnp.maximum(h2 + b2_ref[...], 0.0)
    # Layer 3
    h3 = jnp.dot(h2.astype(jnp.bfloat16), w3_ref[...],
                 preferred_element_type=jnp.float32)
    h3 = jnp.maximum(h3 + b3_ref[...], 0.0)
    # Layer 4 logits, only OUT_STORE=8 columns. The padded class column has
    # zero weights and a -1e30 bias baked in, so no explicit masking is needed.
    logits = jnp.dot(h3.astype(jnp.bfloat16), w4_ref[...],
                     preferred_element_type=jnp.float32)
    logits = logits + b4_ref[...]
    # Softmax over the last axis (matches torch.nn.Softmax on 2-D input).
    m = jnp.max(logits, axis=-1, keepdims=True)
    e = jnp.exp(logits - m)
    denom = jnp.sum(e, axis=-1, keepdims=True)      # (tb, 1)
    o_ref[...] = (e / denom).astype(o_ref.dtype)    # exact normalization


def init_linear(key, fan_in, fan_out):
    # Mimic PyTorch nn.Linear default init: U(-1/sqrt(fan_in), 1/sqrt(fan_in)).
    kw, kb = jax.random.split(key)
    bound = 1.0 / jnp.sqrt(jnp.float32(fan_in))
    w = jax.random.uniform(kw, (fan_in, fan_out), jnp.float32, -bound, bound)
    b = jax.random.uniform(kb, (1, fan_out), jnp.float32, -bound, bound)
    return w, b


def _pad2(a, rows, cols):
    return jnp.pad(a, ((0, rows - a.shape[0]), (0, cols - a.shape[1])))


def prepare_params(params):
    """Zero-pad weights/biases to lane multiples; weights bf16, biases f32.

    Zero padding is exact: padded input/hidden lanes stay 0 through matmul,
    zero bias and ReLU. The padded class column gets a -1e30 bias (weights 0),
    so its softmax contribution is exactly 0 and the kernel needs no mask.
    """
    w1, b1, w2, b2, w3, b3, w4, b4 = params
    w1p = _pad2(w1, IN_PAD, H1_PAD).astype(jnp.bfloat16)
    w2p = _pad2(w2, H1_PAD, H2_PAD).astype(jnp.bfloat16)
    w3p = _pad2(w3, H2_PAD, H3_PAD).astype(jnp.bfloat16)
    w4p = _pad2(w4, H3_PAD, OUT_STORE).astype(jnp.bfloat16)
    b1p = _pad2(b1, 1, H1_PAD)
    b2p = _pad2(b2, 1, H2_PAD)
    b3p = _pad2(b3, 1, H3_PAD)
    b4p = jnp.full((1, OUT_STORE), NEG_BIG, jnp.float32).at[:, :OUT_DIM].set(b4)
    return (w1p, b1p, w2p, b2p, w3p, b3p, w4p, b4p)


@functools.partial(jax.jit, static_argnames=("tile_b",))
def mlp_forward(x, padded_params, tile_b=1024):
    w1, b1, w2, b2, w3, b3, w4, b4 = padded_params
    B = x.shape[0]
    # Tiles are multiples of 16 (bf16 sublane packing). For mid/large batches
    # the min() with ceil(B/2) guarantees >=2 grid steps so both v7x
    # TensorCores get work under dimension_semantics=("parallel",).
    tb = min(tile_b, _round_up(pl.cdiv(B, 2), 16))
    b_pad = _round_up(B, tb)
    # Single fused cast+pad: kernel consumes bf16 x directly (half the DMA of
    # f32), no separate f32 staging round-trip through HBM.
    x_pad = jnp.pad(x.astype(jnp.bfloat16),
                    ((0, b_pad - B), (0, IN_PAD - IN_DIM)))

    weight_bytes = sum(int(a.size) * a.dtype.itemsize
                       for a in (w1, b1, w2, b2, w3, b3, w4, b4))
    cost = pl.CostEstimate(
        flops=2 * b_pad * (IN_PAD * H1_PAD + H1_PAD * H2_PAD
                           + H2_PAD * H3_PAD + H3_PAD * OUT_STORE),
        transcendentals=b_pad * OUT_STORE,
        bytes_accessed=x_pad.size * 2 + weight_bytes + b_pad * OUT_STORE * 4,
    )

    out = pl.pallas_call(
        mlp_kernel,
        out_shape=jax.ShapeDtypeStruct((b_pad, OUT_STORE), jnp.float32),
        grid_spec=pltpu.PrefetchScalarGridSpec(
            num_scalar_prefetch=0,
            grid=(b_pad // tb,),
            in_specs=[
                pl.BlockSpec((tb, IN_PAD), lambda i: (i, 0)),          # x tile
                pl.BlockSpec((IN_PAD, H1_PAD), lambda i: (0, 0)),      # w1 (resident)
                pl.BlockSpec((1, H1_PAD), lambda i: (0, 0)),           # b1
                pl.BlockSpec((H1_PAD, H2_PAD), lambda i: (0, 0)),      # w2
                pl.BlockSpec((1, H2_PAD), lambda i: (0, 0)),           # b2
                pl.BlockSpec((H2_PAD, H3_PAD), lambda i: (0, 0)),      # w3
                pl.BlockSpec((1, H3_PAD), lambda i: (0, 0)),           # b3
                pl.BlockSpec((H3_PAD, OUT_STORE), lambda i: (0, 0)),   # w4 (8 cols)
                pl.BlockSpec((1, OUT_STORE), lambda i: (0, 0)),        # b4 (mask baked in)
            ],
            out_specs=pl.BlockSpec((tb, OUT_STORE), lambda i: (i, 0)),
        ),
        compiler_params=pltpu.CompilerParams(
            dimension_semantics=("parallel",),   # megacore sharding on v7x
            vmem_limit_bytes=32 << 20,           # safe on v7x's 64 MiB VMEM
        ),
        cost_estimate=cost,
    )(x_pad, w1, b1, w2, b2, w3, b3, w4, b4)

    return out[:B, :OUT_DIM]


def reference(x, params):
    """Pure-JAX f32 reference matching the PyTorch forward."""
    w1, b1, w2, b2, w3, b3, w4, b4 = params
    h = jnp.maximum(x @ w1 + b1, 0.0)
    h = jnp.maximum(h @ w2 + b2, 0.0)
    h = jnp.maximum(h @ w3 + b3, 0.0)
    return jax.nn.softmax(h @ w4 + b4, axis=-1)


if __name__ == "__main__":
    key = jax.random.PRNGKey(0)
    k_in, k1, k2, k3, k4 = jax.random.split(key, 5)

    # Layers: 110 -> 400 -> 100 -> 25 -> 7
    w1, b1 = init_linear(k1, IN_DIM, H1)
    w2, b2 = init_linear(k2, H1, H2)
    w3, b3 = init_linear(k3, H2, H3)
    w4, b4 = init_linear(k4, H3, OUT_DIM)
    params = (w1, b1, w2, b2, w3, b3, w4, b4)
    padded_params = prepare_params(params)

    B = 8
    x = jax.random.normal(k_in, (B, IN_DIM), jnp.float32)

    y = mlp_forward(x, padded_params)
    jax.block_until_ready(y)

    # Sanity checks: shape, softmax rows sum to 1 (exact normalization),
    # and closeness to an f32 reference (bf16 matmul tolerance).
    assert y.shape == (B, OUT_DIM)
    assert jnp.allclose(jnp.sum(y, axis=-1), 1.0, atol=1e-3)
    y_ref = reference(x, params)
    assert jnp.allclose(y, y_ref, atol=5e-2), float(jnp.max(jnp.abs(y - y_ref)))

    print("KERNEL_OK")
</pallas_src>

<mosaic_0001>
module attributes {stable_mosaic.version = 11 : i64} {
  func.func @mlp_kernel(%arg0: i32, %arg1: memref<16x128xbf16, #tpu.memory_space<vmem>>, %arg2: memref<128x512xbf16, #tpu.memory_space<vmem>>, %arg3: memref<1x512xf32, #tpu.memory_space<vmem>>, %arg4: memref<512x128xbf16, #tpu.memory_space<vmem>>, %arg5: memref<1x128xf32, #tpu.memory_space<vmem>>, %arg6: memref<128x128xbf16, #tpu.memory_space<vmem>>, %arg7: memref<1x128xf32, #tpu.memory_space<vmem>>, %arg8: memref<128x8xbf16, #tpu.memory_space<vmem>>, %arg9: memref<1x8xf32, #tpu.memory_space<vmem>>, %arg10: memref<16x8xf32, #tpu.memory_space<vmem>>) attributes {dimension_semantics = [#tpu.dimension_semantics<parallel>], iteration_bounds = array<i64: 1>, scalar_prefetch = 0 : i64, scratch_operands = 0 : i64, tpu.core_type = #tpu.core_type<tc>, window_params = [{transform_indices = @transform_0, window_bounds = array<i64: 16, 128>}, {pipeline_mode = #tpu.pipeline_mode<synchronous>, transform_indices = @transform_1, window_bounds = array<i64: 128, 512>}, {pipeline_mode = #tpu.pipeline_mode<synchronous>, transform_indices = @transform_2, window_bounds = array<i64: 1, 512>}, {pipeline_mode = #tpu.pipeline_mode<synchronous>, transform_indices = @transform_3, window_bounds = array<i64: 512, 128>}, {pipeline_mode = #tpu.pipeline_mode<synchronous>, transform_indices = @transform_4, window_bounds = array<i64: 1, 128>}, {pipeline_mode = #tpu.pipeline_mode<synchronous>, transform_indices = @transform_5, window_bounds = array<i64: 128, 128>}, {pipeline_mode = #tpu.pipeline_mode<synchronous>, transform_indices = @transform_6, window_bounds = array<i64: 1, 128>}, {pipeline_mode = #tpu.pipeline_mode<synchronous>, transform_indices = @transform_7, window_bounds = array<i64: 128, 8>}, {pipeline_mode = #tpu.pipeline_mode<synchronous>, transform_indices = @transform_8, window_bounds = array<i64: 1, 8>}, {transform_indices = @transform_9, window_bounds = array<i64: 16, 8>}]} {
    %c0 = arith.constant 0 : index
    %c0_0 = arith.constant 0 : index
    %0 = vector.load %arg1[%c0, %c0_0] : memref<16x128xbf16, #tpu.memory_space<vmem>>, vector<16x128xbf16>
    %c0_1 = arith.constant 0 : index
    %c0_2 = arith.constant 0 : index
    %1 = vector.load %arg2[%c0_1, %c0_2] : memref<128x512xbf16, #tpu.memory_space<vmem>>, vector<128x512xbf16>
    %cst = arith.constant dense<0.000000e+00> : vector<16x512xf32>
    %2 = tpu.matmul %0, %1, %cst {dimension_numbers = #tpu.dot_dimension_numbers<[1], [0], [0], [1], [0, 0, 1, 1], [], []>} : vector<16x128xbf16>, vector<128x512xbf16>, vector<16x512xf32> -> vector<16x512xf32>
    %c0_3 = arith.constant 0 : index
    %c0_4 = arith.constant 0 : index
    %3 = vector.load %arg3[%c0_3, %c0_4] : memref<1x512xf32, #tpu.memory_space<vmem>>, vector<1x512xf32>
    %4 = vector.broadcast %3 : vector<1x512xf32> to vector<16x512xf32>
    %5 = arith.addf %2, %4 : vector<16x512xf32>
    %cst_5 = arith.constant 0.000000e+00 : f32
    %6 = vector.broadcast %cst_5 : f32 to vector<16x512xf32>
    %7 = arith.maximumf %5, %6 : vector<16x512xf32>
    %8 = arith.truncf %7 : vector<16x512xf32> to vector<16x512xbf16>
    %c0_6 = arith.constant 0 : index
    %c0_7 = arith.constant 0 : index
    %9 = vector.load %arg4[%c0_6, %c0_7] : memref<512x128xbf16, #tpu.memory_space<vmem>>, vector<512x128xbf16>
    %cst_8 = arith.constant dense<0.000000e+00> : vector<16x128xf32>
    %10 = tpu.matmul %8, %9, %cst_8 {dimension_numbers = #tpu.dot_dimension_numbers<[1], [0], [0], [1], [0, 0, 1, 1], [], []>} : vector<16x512xbf16>, vector<512x128xbf16>, vector<16x128xf32> -> vector<16x128xf32>
    %c0_9 = arith.constant 0 : index
    %c0_10 = arith.constant 0 : index
    %11 = vector.load %arg5[%c0_9, %c0_10] : memref<1x128xf32, #tpu.memory_space<vmem>>, vector<1x128xf32>
    %12 = vector.broadcast %11 : vector<1x128xf32> to vector<16x128xf32>
    %13 = arith.addf %10, %12 : vector<16x128xf32>
    %cst_11 = arith.constant 0.000000e+00 : f32
    %14 = vector.broadcast %cst_11 : f32 to vector<16x128xf32>
    %15 = arith.maximumf %13, %14 : vector<16x128xf32>
    %16 = arith.truncf %15 : vector<16x128xf32> to vector<16x128xbf16>
    %c0_12 = arith.constant 0 : index
    %c0_13 = arith.constant 0 : index
    %17 = vector.load %arg6[%c0_12, %c0_13] : memref<128x128xbf16, #tpu.memory_space<vmem>>, vector<128x128xbf16>
    %cst_14 = arith.constant dense<0.000000e+00> : vector<16x128xf32>
    %18 = tpu.matmul %16, %17, %cst_14 {dimension_numbers = #tpu.dot_dimension_numbers<[1], [0], [0], [1], [0, 0, 1, 1], [], []>} : vector<16x128xbf16>, vector<128x128xbf16>, vector<16x128xf32> -> vector<16x128xf32>
    %c0_15 = arith.constant 0 : index
    %c0_16 = arith.constant 0 : index
    %19 = vector.load %arg7[%c0_15, %c0_16] : memref<1x128xf32, #tpu.memory_space<vmem>>, vector<1x128xf32>
    %20 = vector.broadcast %19 : vector<1x128xf32> to vector<16x128xf32>
    %21 = arith.addf %18, %20 : vector<16x128xf32>
    %cst_17 = arith.constant 0.000000e+00 : f32
    %22 = vector.broadcast %cst_17 : f32 to vector<16x128xf32>
    %23 = arith.maximumf %21, %22 : vector<16x128xf32>
    %24 = arith.truncf %23 : vector<16x128xf32> to vector<16x128xbf16>
    %c0_18 = arith.constant 0 : index
    %c0_19 = arith.constant 0 : index
    %25 = vector.load %arg8[%c0_18, %c0_19] : memref<128x8xbf16, #tpu.memory_space<vmem>>, vector<128x8xbf16>
    %cst_20 = arith.constant dense<0.000000e+00> : vector<16x8xf32>
    %26 = tpu.matmul %24, %25, %cst_20 {dimension_numbers = #tpu.dot_dimension_numbers<[1], [0], [0], [1], [0, 0, 1, 1], [], []>} : vector<16x128xbf16>, vector<128x8xbf16>, vector<16x8xf32> -> vector<16x8xf32>
    %c0_21 = arith.constant 0 : index
    %c0_22 = arith.constant 0 : index
    %27 = vector.load %arg9[%c0_21, %c0_22] : memref<1x8xf32, #tpu.memory_space<vmem>>, vector<1x8xf32>
    %28 = vector.broadcast %27 : vector<1x8xf32> to vector<16x8xf32>
    %29 = arith.addf %26, %28 : vector<16x8xf32>
    %cst_23 = arith.constant dense<0xFF800000> : vector<16xf32>
    %30 = vector.multi_reduction <maximumf>, %29, %cst_23 [1] : vector<16x8xf32> to vector<16xf32>
    %31 = vector.shape_cast %30 : vector<16xf32> to vector<16x1xf32>
    %32 = vector.broadcast %31 : vector<16x1xf32> to vector<16x8xf32>
    %33 = arith.subf %29, %32 : vector<16x8xf32>
    %34 = math.exp %33 : vector<16x8xf32>
    %cst_24 = arith.constant dense<0.000000e+00> : vector<16xf32>
    %35 = vector.multi_reduction <add>, %34, %cst_24 [1] : vector<16x8xf32> to vector<16xf32>
    %36 = vector.shape_cast %35 : vector<16xf32> to vector<16x1xf32>
    %37 = vector.broadcast %36 : vector<16x1xf32> to vector<16x8xf32>
    %38 = arith.divf %34, %37 : vector<16x8xf32>
    %c0_25 = arith.constant 0 : index
    %c0_26 = arith.constant 0 : index
    %39 = vector.load %arg10[%c0_25, %c0_26] : memref<16x8xf32, #tpu.memory_space<vmem>>, vector<16x8xf32>
    tpu.vector_store %arg10[%c0_25, %c0_26], %38 {strides = array<i32>} : memref<16x8xf32, #tpu.memory_space<vmem>>, vector<16x8xf32>,
    return
  }
  func.func @transform_0(%arg0: i32) -> (i32, i32) {
    %c0_i32 = arith.constant 0 : i32
    %c0_i32_0 = arith.constant 0 : i32
    return %arg0, %c0_i32 : i32, i32
  }
  func.func @transform_1(%arg0: i32) -> (i32, i32) {
    %c0_i32 = arith.constant 0 : i32
    %c0_i32_0 = arith.constant 0 : i32
    %c0_i32_1 = arith.constant 0 : i32
    return %c0_i32, %c0_i32_0 : i32, i32
  }
  func.func @transform_2(%arg0: i32) -> (i32, i32) {
    %c0_i32 = arith.constant 0 : i32
    %c0_i32_0 = arith.constant 0 : i32
    %c0_i32_1 = arith.constant 0 : i32
    return %c0_i32, %c0_i32_0 : i32, i32
  }
  func.func @transform_3(%arg0: i32) -> (i32, i32) {
    %c0_i32 = arith.constant 0 : i32
    %c0_i32_0 = arith.constant 0 : i32
    %c0_i32_1 = arith.constant 0 : i32
    return %c0_i32, %c0_i32_0 : i32, i32
  }
  func.func @transform_4(%arg0: i32) -> (i32, i32) {
    %c0_i32 = arith.constant 0 : i32
    %c0_i32_0 = arith.constant 0 : i32
    %c0_i32_1 = arith.constant 0 : i32
    return %c0_i32, %c0_i32_0 : i32, i32
  }
  func.func @transform_5(%arg0: i32) -> (i32, i32) {
    %c0_i32 = arith.constant 0 : i32
    %c0_i32_0 = arith.constant 0 : i32
    %c0_i32_1 = arith.constant 0 : i32
    return %c0_i32, %c0_i32_0 : i32, i32
  }
  func.func @transform_6(%arg0: i32) -> (i32, i32) {
    %c0_i32 = arith.constant 0 : i32
    %c0_i32_0 = arith.constant 0 : i32
    %c0_i32_1 = arith.constant 0 : i32
    return %c0_i32, %c0_i32_0 : i32, i32
  }
  func.func @transform_7(%arg0: i32) -> (i32, i32) {
    %c0_i32 = arith.constant 0 : i32
    %c0_i32_0 = arith.constant 0 : i32
    %c0_i32_1 = arith.constant 0 : i32
    return %c0_i32, %c0_i32_0 : i32, i32
  }
  func.func @transform_8(%arg0: i32) -> (i32, i32) {
    %c0_i32 = arith.constant 0 : i32
    %c0_i32_0 = arith.constant 0 : i32
    %c0_i32_1 = arith.constant 0 : i32
    return %c0_i32, %c0_i32_0 : i32, i32
  }
  func.func @transform_9(%arg0: i32) -> (i32, i32) {
    %c0_i32 = arith.constant 0 : i32
    %c0_i32_0 = arith.constant 0 : i32
    return %arg0, %c0_i32 : i32, i32
  }
}

</mosaic_0001>

<bundles_post_ra>
// kernel: mlp_forward.1
= control target key start
LH: loop header
LB: loop body
LE: loop exit
PB: predicated region body
PF: predicated region fallthrough
CT: control target
= control target key end

     0   :  { %14 = vsyncpa [#allocation3], 0  ;;  %s1511_s0 = inlined_call_operand.vmem [shape: bf16[16,128], index: 0, kind: input, shape index: {}]   ;;  %s1512_s1 = inlined_call_operand.hbm [shape: bf16[128,512], index: 1, kind: input, shape index: {}]   ;;  %s1513_s2 = inlined_call_operand.vmem [shape: f32[1,512], index: 2, kind: input, shape index: {}]   ;;  %s1514_s3 = inlined_call_operand.hbm [shape: bf16[512,128], index: 3, kind: input, shape index: {}]   ;;  %s1515_s4 = inlined_call_operand.vmem [shape: f32[1,128], index: 4, kind: input, shape index: {}]   ;;  %s1516_s5 = inlined_call_operand.vmem [shape: bf16[128,128], index: 5, kind: input, shape index: {}]   ;;  %s1517_s6 = inlined_call_operand.vmem [shape: f32[1,128], index: 6, kind: input, shape index: {}]   ;;  %s1518_s7 = inlined_call_operand.vmem [shape: bf16[128,8], index: 7, kind: input, shape index: {}]   ;;  %s1519_s8 = inlined_call_operand.vmem [shape: f32[1,8], index: 8, kind: input, shape index: {}]   ;;  %s1520_s9 = inlined_call_operand.vmem [shape: f32[16,8], index: 9, kind: output, shape index: {}]  }
   0x1   :  { %15 = vsyncpa [#allocation5], 0  ;;  %s1335_s30 = smov [#allocation2]   ;;  %s1287_s13 = scalar_lea.hbm %s1512_s1, 4096 }
   0x2   :  { %s23_s10 = sshll.u32 %s1335_s30, 4  ;;  %p1288_p0 = scmp.ne.s32.totalorder %s1512_s1, %s1287_s13  ;;  %s24_s10 = int_to_ptr.vmem [resolvable:$true] %s23_s10 }
   0x3   :  { %p1291_p1 = scmp.lt.u32.totalorder %s1287_s13, %s1512_s1 }
   0x5   :  { %p1293_p2 = pnand %p1291_p1, %p1288_p0 }
   0x7   :  { %1296 = shalt.err (!%p1293_p2)
}
   0x8   :  { %s1297_s18 = scalar_lea.vmem %s24_s10, 4096  ;;  %p1302_p4 = scmp.lt.s32.totalorder %s24_s10, %s24_s10 }
   0x9   :  { %p1298_p3 = scmp.ne.s32.totalorder %s24_s10, %s1297_s18  ;;  %p1303_p5 = scmp.lt.s32.totalorder %s1297_s18, %s1297_s18 }
   0xb   :  { %p1304_p6 = por %p1303_p5, %p1302_p4 }
   0xd   :  { %p1305_p7 = pnand %p1304_p6, %p1298_p3 }
   0xf   :  { %1308 = shalt.err (!%p1305_p7)
}
  0x10   :  { %s1336_s19 = smov 256   ;;  %s1337_s20 = smov 16  }
  0x11   :  { %29 = dma.hbm_to_vmem [thread:$0]  %s1512_s1, 4096, %s24_s10, [#allocation3], %s1336_s19, %s1336_s19, %s1337_s20  }
  0x12   :  { %s1338_s23 = smov [#allocation4]   ;;  %s1309_s27 = scalar_lea.hbm %s1514_s3, 4096 }
  0x13   :  { %s37_s24 = sshll.u32 %s1338_s23, 4  ;;  %p1310_p8 = scmp.ne.s32.totalorder %s1514_s3, %s1309_s27  ;;  %s38_s24 = int_to_ptr.vmem [resolvable:$true] %s37_s24 }
  0x14   :  { %p1313_p9 = scmp.lt.u32.totalorder %s1309_s27, %s1514_s3 }
  0x16   :  { %p1315_p10 = pnand %p1313_p9, %p1310_p8 }
  0x18   :  { %1318 = shalt.err (!%p1315_p10)
}
  0x19   :  { %s1319_s12 = scalar_lea.vmem %s38_s24, 4096  ;;  %p1324_p12 = scmp.lt.s32.totalorder %s38_s24, %s38_s24 }
  0x1a   :  { %p1320_p11 = scmp.ne.s32.totalorder %s38_s24, %s1319_s12  ;;  %p1325_p13 = scmp.lt.s32.totalorder %s1319_s12, %s1319_s12 }
  0x1c   :  { %p1326_p0 = por %p1325_p13, %p1324_p12 }
  0x1e   :  { %p1327_p1 = pnand %p1326_p0, %p1320_p11 }
  0x20   :  { %1330 = shalt.err (!%p1327_p1)
}
  0x21   :  { %s1339_s1 = smov 64   ;;  %s1340_s10 = smov 4  }
  0x22   :  { %43 = dma.hbm_to_vmem [thread:$0]  %s1514_s3, 4096, %s38_s24, [#allocation5], %s1339_s1, %s1339_s1, %s1340_s10  }
  0x23   :  { %1331 = dma.done.wait [#allocation3], 4096  }
  0x24   :  { %1332 = vsyncadd [#allocation3], 4294963200 }
  0x25   :  { %1333 = dma.done.wait [#allocation5], 4096  }
  0x26   :  { %1334 = vsyncadd [#allocation5], 4294963200  ;;  %v1341_v0 = vmov 0   ;;  %v1182_v1 = vld [vmem:[#allocation2 + $0x4] ss:$16 sps:$4 sm:$0xff]   ;;  %v1235_v38 = vld [vmem:[#allocation4 + $0x48] sm:$0xff]  }
  0x27   :  { %315 = vmatprep.mubr.bf16.mxu0 %v1341_v0  ;;  %358 = vmatprep.mubr.bf16.mxu1 %v1341_v0  ;;  %v1184_v2 = vld [vmem:[#allocation2 + $0xc] ss:$16 sps:$4 sm:$0xff]   ;;  %v1186_v3 = vld [vmem:[#allocation2] ss:$16 sps:$4 sm:$0xff]   ;;  %v1187_v4 = vld [vmem:[#allocation2 + $0x8] ss:$16 sps:$4 sm:$0xff]  }
  0x28   :  { %283 = vmatprep.subr.bf16.mxu0 %v1182_v1  ;;  %326 = vmatprep.subr.bf16.mxu1 %v1184_v2  ;;  %v1188_v5 = vld [vmem:[#allocation2 + $0x24] ss:$16 sps:$4 sm:$0xff]   ;;  %v1190_v6 = vld [vmem:[#allocation2 + $0x2c] ss:$16 sps:$4 sm:$0xff]   ;;  %v1192_v7 = vld [vmem:[#allocation2 + $0x20] ss:$16 sps:$4 sm:$0xff]  }
  0x29   :  { %284 = vmatpush1.bf16.msra.mxu0 %v1186_v3  ;;  %327 = vmatpush1.bf16.msra.mxu1 %v1187_v4  ;;  %v1193_v8 = vld [vmem:[#allocation2 + $0x28] ss:$16 sps:$4 sm:$0xff]   ;;  %v1194_v9 = vld [vmem:[#allocation2 + $0x44] ss:$16 sps:$4 sm:$0xff]   ;;  %v1196_v10 = vld [vmem:[#allocation2 + $0x4c] ss:$16 sps:$4 sm:$0xff]   ;;  %v97_v3 = vlaneseq }
  0x2a   :  { %285 = vmatprep.subr.bf16.mxu0 %v1188_v5  ;;  %328 = vmatprep.subr.bf16.mxu1 %v1190_v6  ;;  %v1198_v11 = vld [vmem:[#allocation2 + $0x40] ss:$16 sps:$4 sm:$0xff]   ;;  %v1199_v12 = vld [vmem:[#allocation2 + $0x48] ss:$16 sps:$4 sm:$0xff]   ;;  %v1200_v13 = vld [vmem:[#allocation2 + $0x64] ss:$16 sps:$4 sm:$0xff]  }
  0x2b   :  { %v1202_v14 = vld [vmem:[#allocation2 + $0x6c] ss:$16 sps:$4 sm:$0xff]   ;;  %v1204_v15 = vld [vmem:[#allocation2 + $0x60] ss:$16 sps:$4 sm:$0xff]   ;;  %v1205_v16 = vld [vmem:[#allocation2 + $0x68] ss:$16 sps:$4 sm:$0xff]  }
  0x2c   :  { %v1206_v17 = vld [vmem:[#allocation2 + $0x84] ss:$16 sps:$4 sm:$0xff]   ;;  %v1208_v18 = vld [vmem:[#allocation2 + $0x8c] ss:$16 sps:$4 sm:$0xff]   ;;  %v1210_v19 = vld [vmem:[#allocation2 + $0x80] ss:$16 sps:$4 sm:$0xff]  }
  0x2d   :  { %286 = vmatpush1.bf16.msra.mxu0 %v1192_v7  ;;  %329 = vmatpush1.bf16.msra.mxu1 %v1193_v8  ;;  %v1211_v20 = vld [vmem:[#allocation2 + $0x88] ss:$16 sps:$4 sm:$0xff]   ;;  %v1212_v21 = vld [vmem:[#allocation2 + $0xa4] ss:$16 sps:$4 sm:$0xff]   ;;  %v1214_v22 = vld [vmem:[#allocation2 + $0xac] ss:$16 sps:$4 sm:$0xff]  }
  0x2e   :  { %287 = vmatprep.subr.bf16.mxu0 %v1194_v9  ;;  %330 = vmatprep.subr.bf16.mxu1 %v1196_v10  ;;  %v1216_v23 = vld [vmem:[#allocation2 + $0xa0] ss:$16 sps:$4 sm:$0xff]   ;;  %v1217_v24 = vld [vmem:[#allocation2 + $0xa8] ss:$16 sps:$4 sm:$0xff]   ;;  %v1218_v25 = vld [vmem:[#allocation2 + $0xc4] ss:$16 sps:$4 sm:$0xff]  }
  0x2f   :  { %v1220_v26 = vld [vmem:[#allocation2 + $0xcc] ss:$16 sps:$4 sm:$0xff]   ;;  %v1222_v27 = vld [vmem:[#allocation2 + $0xc0] ss:$16 sps:$4 sm:$0xff]   ;;  %v1223_v28 = vld [vmem:[#allocation2 + $0xc8] ss:$16 sps:$4 sm:$0xff]  }
  0x30   :  { %v1224_v29 = vld [vmem:[#allocation2 + $0xe4] ss:$16 sps:$4 sm:$0xff]   ;;  %v1226_v30 = vld [vmem:[#allocation2 + $0xec] ss:$16 sps:$4 sm:$0xff]   ;;  %v1228_v31 = vld [vmem:[#allocation2 + $0xe0] ss:$16 sps:$4 sm:$0xff]  }
  0x31   :  { %288 = vmatpush1.bf16.msra.mxu0 %v1198_v11  ;;  %331 = vmatpush1.bf16.msra.mxu1 %v1199_v12  ;;  %v1229_v32 = vld [vmem:[#allocation2 + $0xe8] ss:$16 sps:$4 sm:$0xff]   ;;  %v1231_v33 = vld [vmem:[#allocation4 + $0x40] sm:$0xff]   ;;  %v1239_v42 = vld [vmem:[#allocation4 + $0x50] sm:$0xff]   ;;  %v1342_v2 = vmov 0.0   ;;  %v98_v4 = vshrl.u32 %v97_v3, 7 }
  0x32   :  { %289 = vmatprep.subr.bf16.mxu0 %v1200_v13  ;;  %332 = vmatprep.subr.bf16.mxu1 %v1202_v14  ;;  %v1230_v34 = vld [vmem:[%s1511_s0] sm:$0xff]   ;;  %v1236_v39 = vld [vmem:[#allocation4 + $0xc8] sm:$0xff]   ;;  %v1240_v43 = vld [vmem:[#allocation4 + $0xd0] sm:$0xff]   ;;  %vm1343_vm0 = vmmov 0   ;;  %vm956_vm1 = vcmask 64512  }
  0x33   :  { %v1232_v35 = vld [vmem:[#allocation4 + $0xc0] sm:$0xff]   ;;  %v1237_v40 = vld [vmem:[#allocation4 + $0x8] sm:$0xff]   ;;  %v1241_v44 = vld [vmem:[#allocation4 + $0x10] sm:$0xff]   ;;  %v99_v5 = vsub.s32 0, %v98_v4  ;;  %v107_v6 = vsub.s32 2, %v98_v4  ;;  %v103_v8 = vsub.s32 1, %v98_v4 }
  0x34   :  { %v1233_v36 = vld [vmem:[#allocation4] sm:$0xff]   ;;  %v1238_v41 = vld [vmem:[#allocation4 + $0x88] sm:$0xff]   ;;  %v1242_v45 = vld [vmem:[#allocation4 + $0x90] sm:$0xff]   ;;  %v111_v9 = vsub.s32 3, %v98_v4 }
  0x35   :  { %290 = vmatpush1.bf16.msra.mxu0 %v1204_v15  ;;  %333 = vmatpush1.bf16.msra.mxu1 %v1205_v16  ;;  %v1234_v37 = vld [vmem:[#allocation4 + $0x80] sm:$0xff]   ;;  %v1243_v46 = vld [vmem:[#allocation4 + $0x58] sm:$0xff]   ;;  %v1251_v54 = vld [vmem:[#allocation4 + $0x68] sm:$0xff]  }
  0x36   :  { %291 = vmatprep.subr.bf16.mxu0 %v1206_v17  ;;  %334 = vmatprep.subr.bf16.mxu1 %v1208_v18  ;;  %v1244_v47 = vld [vmem:[#allocation4 + $0xd8] sm:$0xff]   ;;  %v1247_v50 = vld [vmem:[#allocation4 + $0x60] sm:$0xff]   ;;  %v1252_v55 = vld [vmem:[#allocation4 + $0xe8] sm:$0xff]  }
  0x37   :  { %v1245_v48 = vld [vmem:[#allocation4 + $0x18] sm:$0xff]   ;;  %v1248_v51 = vld [vmem:[#allocation4 + $0xe0] sm:$0xff]   ;;  %v1253_v56 = vld [vmem:[#allocation4 + $0x28] sm:$0xff]  }
  0x38   :  { %v1246_v49 = vld [vmem:[#allocation4 + $0x98] sm:$0xff]   ;;  %v1249_v52 = vld [vmem:[#allocation4 + $0x20] sm:$0xff]   ;;  %v1254_v57 = vld [vmem:[#allocation4 + $0xa8] sm:$0xff]  }
  0x39   :  { %292 = vmatpush1.bf16.msra.mxu0 %v1210_v19  ;;  %335 = vmatpush1.bf16.msra.mxu1 %v1211_v20  ;;  %v1250_v53 = vld [vmem:[#allocation4 + $0xa0] sm:$0xff]   ;;  %v1255_v58 = vld [vmem:[#allocation4 + $0x70] sm:$0xff]   ;;  %v1259_v62 = vld [vmem:[#allocation4 + $0x78] sm:$0xff]  }
  0x3a   :  { %293 = vmatprep.subr.bf16.mxu0 %v1212_v21  ;;  %336 = vmatprep.subr.bf16.mxu1 %v1214_v22  ;;  %v1256_v59 = vld [vmem:[#allocation4 + $0xf0] sm:$0xff]   ;;  %v1260_v63 = vld [vmem:[#allocation4 + $0xf8] sm:$0xff]   ;;  %v95_v7 = vld [vmem:[%s1513_s2] sm:$0xf] }
  0x3b   :  { %v1257_v60 = vld [vmem:[#allocation4 + $0x30] sm:$0xff]   ;;  %v1261_v0 = vld [vmem:[#allocation4 + $0x38] sm:$0xff]   ;;  %v100_v10 = vrot.slane %v95_v7, %v99_v5  ;;  %v108_v11 = vrot.slane %v95_v7, %v107_v6  ;;  %v104_v12 = vrot.slane %v95_v7, %v103_v8  ;;  %v112_v13 = vrot.slane %v95_v7, %v111_v9 }
  0x3c   :  { %v1258_v61 = vld [vmem:[#allocation4 + $0xb0] sm:$0xff]   ;;  %v1262_v1 = vld [vmem:[#allocation4 + $0xb8] sm:$0xff]  }
  0x3d   :  { %294 = vmatpush1.bf16.msra.mxu0 %v1216_v23  ;;  %337 = vmatpush1.bf16.msra.mxu1 %v1217_v24 }
  0x3e   :  { %295 = vmatprep.subr.bf16.mxu0 %v1218_v25  ;;  %338 = vmatprep.subr.bf16.mxu1 %v1220_v26 }
  0x41   :  { %296 = vmatpush1.bf16.msra.mxu0 %v1222_v27  ;;  %339 = vmatpush1.bf16.msra.mxu1 %v1223_v28 }
  0x42   :  { %297 = vmatprep.subr.bf16.mxu0 %v1224_v29  ;;  %340 = vmatprep.subr.bf16.mxu1 %v1226_v30 }
  0x45   :  { %298 = vmatpush1.bf16.msra.mxu0 %v1228_v31  ;;  %341 = vmatpush1.bf16.msra.mxu1 %v1229_v32 }
  0x46   :  { %1071 = vmatprep.subr.bf16.mxu0 %v1231_v33  ;;  %1093 = vmatprep.subr.bf16.mxu1 %v1232_v35 }
  0x48   :  { %316 = vmatmul.mubr.bf16.vlgmr.msra.gmra.mrb[0].mxu0 %v1230_v34  ;;  %359 = vmatmul.mubr.bf16.vlgmr.msra.gmra.mrb[0].mxu1 %v1230_v34 }
  0x49   :  { %1072 = vmatpush3.bf16.msra.mxu0 %v1233_v36  ;;  %1094 = vmatpush3.bf16.msra.mxu1 %v1234_v37 }
  0x4a   :  { %1073 = vmatprep.subr.bf16.mxu0 %v1235_v38  ;;  %1095 = vmatprep.subr.bf16.mxu1 %v1236_v39 }
  0x4d   :  { %1074 = vmatpush3.bf16.msra.mxu0 %v1237_v40  ;;  %1096 = vmatpush3.bf16.msra.mxu1 %v1238_v41 }
  0x4e   :  { %1075 = vmatprep.subr.bf16.mxu0 %v1239_v42  ;;  %1097 = vmatprep.subr.bf16.mxu1 %v1240_v43  ;;  %v1263_v42 = vld [vmem:[%s1516_s5] sm:$0xff]   ;;  %v1264_v43 = vld [vmem:[%s1516_s5 + $0x8] sm:$0xff]  }
  0x51   :  { %1076 = vmatpush3.bf16.msra.mxu0 %v1241_v44  ;;  %1098 = vmatpush3.bf16.msra.mxu1 %v1242_v45  ;;  %v1265_v44 = vld [vmem:[%s1516_s5 + $0x10] sm:$0xff]   ;;  %v1266_v45 = vld [vmem:[%s1516_s5 + $0x18] sm:$0xff]  }
  0x52   :  { %1077 = vmatprep.subr.bf16.mxu0 %v1243_v46  ;;  %1099 = vmatprep.subr.bf16.mxu1 %v1244_v47  ;;  %v1267_v46 = vld [vmem:[%s1516_s5 + $0x20] sm:$0xff]   ;;  %v1268_v47 = vld [vmem:[%s1516_s5 + $0x28] sm:$0xff]  }
  0x55   :  { %1078 = vmatpush3.bf16.msra.mxu0 %v1245_v48  ;;  %1100 = vmatpush3.bf16.msra.mxu1 %v1246_v49  ;;  %v1269_v48 = vld [vmem:[%s1516_s5 + $0x30] sm:$0xff]   ;;  %v1270_v49 = vld [vmem:[%s1516_s5 + $0x38] sm:$0xff]  }
  0x56   :  { %1079 = vmatprep.subr.bf16.mxu0 %v1247_v50  ;;  %1101 = vmatprep.subr.bf16.mxu1 %v1248_v51  ;;  %v1271_v50 = vld [vmem:[%s1518_s7] sm:$0xff]   ;;  %v1272_v51 = vld [vmem:[%s1518_s7 + $0x8] sm:$0xff]  }
  0x59   :  { %1080 = vmatpush3.bf16.msra.mxu0 %v1249_v52  ;;  %1102 = vmatpush3.bf16.msra.mxu1 %v1250_v53  ;;  %v1273_v52 = vld [vmem:[%s1518_s7 + $0x10] sm:$0xff]   ;;  %v1274_v53 = vld [vmem:[%s1518_s7 + $0x18] sm:$0xff]  }
  0x5a   :  { %1081 = vmatprep.subr.bf16.mxu0 %v1251_v54  ;;  %1103 = vmatprep.subr.bf16.mxu1 %v1252_v55  ;;  %v1275_v54 = vld [vmem:[%s1518_s7 + $0x20] sm:$0xff]   ;;  %v1276_v55 = vld [vmem:[%s1518_s7 + $0x28] sm:$0xff]  }
  0x5d   :  { %1082 = vmatpush3.bf16.msra.mxu0 %v1253_v56  ;;  %1104 = vmatpush3.bf16.msra.mxu1 %v1254_v57 }
  0x5e   :  { %1083 = vmatprep.subr.bf16.mxu0 %v1255_v58  ;;  %1105 = vmatprep.subr.bf16.mxu1 %v1256_v59  ;;  %v1020_v58 = vld [vmem:[%s1515_s4] ss:$0 sm:$0xff] }
  0x61   :  { %1084 = vmatpush3.bf16.msra.mxu0 %v1257_v60  ;;  %1106 = vmatpush3.bf16.msra.mxu1 %v1258_v61 }
  0x62   :  { %1085 = vmatprep.subr.bf16.mxu0 %v1259_v62  ;;  %1107 = vmatprep.subr.bf16.mxu1 %v1260_v63 }
  0x65   :  { %1086 = vmatpush3.bf16.msra.mxu0 %v1261_v0  ;;  %1108 = vmatpush3.bf16.msra.mxu1 %v1262_v1 }
  0x66   :  { %1133 = vmatprep.subr.bf16.mxu0 %v1342_v2  ;;  %1153 = vmatprep.subr.bf16.mxu1 %v1342_v2 }
 0x11b   :  { %v317_v14 = vpop.f32.mrb[0].mxu0  ;;  %v360_v15 = vpop.f32.mrb[0].mxu1 }
 0x11c   :  { %v318_v16 = vadd.f32 %v317_v14, %v100_v10  ;;  %v361_v17 = vadd.f32 %v360_v15, %v108_v11  ;;  %v319_v18 = vpop.f32.mrb[1].mxu0  ;;  %v362_v19 = vpop.f32.mrb[1].mxu1  ;;  %v1278_v14 = vld [vmem:[%s1518_s7 + $0x38] sm:$0xff]   ;;  %v1053_v15 = vld [vmem:[%s1517_s6] ss:$0 sm:$0xff] }
 0x11d   :  { %v320_v20 = vadd.f32 %v319_v18, %v104_v12  ;;  %v363_v21 = vadd.f32 %v362_v19, %v112_v13  ;;  %v321_v22 = vpop.f32.mrb[2].mxu0  ;;  %v364_v23 = vpop.f32.mrb[2].mxu1 }
 0x11e   :  { %v371_v24 = vmax.f32 %v361_v17, 0.0  ;;  %v322_v25 = vadd.f32 %v321_v22, %v100_v10  ;;  %v365_v26 = vadd.f32 %v364_v23, %v108_v11  ;;  %v323_v27 = vpop.f32.mrb[3].mxu0  ;;  %v366_v28 = vpop.f32.mrb[3].mxu1  ;;  %v369_v32 = vmax.f32 %v318_v16, 0.0 }
 0x11f   :  { %v372_v29 = vmax.f32 %v363_v21, 0.0  ;;  %v324_v30 = vadd.f32 %v323_v27, %v104_v12  ;;  %v367_v31 = vadd.f32 %v366_v28, %v112_v13  ;;  %v370_v35 = vmax.f32 %v320_v20, 0.0  ;;  %v1277_v13 = vld [vmem:[%s1518_s7 + $0x30] sm:$0xff]  }
 0x120   :  { %v373_v33 = vmax.f32 %v322_v25, 0.0  ;;  %v375_v34 = vmax.f32 %v365_v26, 0.0 }
 0x121   :  { %v374_v36 = vmax.f32 %v324_v30, 0.0  ;;  %v376_v37 = vmax.f32 %v367_v31, 0.0 }
 0x122   :  { %v377_v38 = vpack.c.bf16 %v373_v33, %v369_v32  ;;  %v379_v39 = vpack.c.bf16 %v375_v34, %v371_v24 }
 0x123   :  { %v378_v40 = vpack.c.bf16 %v374_v36, %v370_v35  ;;  %v380_v41 = vpack.c.bf16 %v376_v37, %v372_v29 }
 0x125   :  { %676 = vmatprep.mubr.bf16.mxu0 %v378_v40  ;;  %717 = vmatprep.mubr.bf16.mxu1 %v380_v41 }
 0x126   :  { %677 = vmatmul.mubr.bf16.vlgmr.msra.gmra.mrb[4].mxu0 %v377_v38  ;;  %718 = vmatmul.mubr.bf16.vlgmr.msra.gmra.mrb[4].mxu1 %v379_v39 }
 0x127   :  { %1134 = vmatpush3.bf16.msra.mxu0 %v1263_v42  ;;  %1149 = vmatprep.mubr.msk.bf16.mxu0 %vm1343_vm0, %v1342_v2 }
 0x128   :  { %1135 = vmatprep.subr.bf16.mxu0 %v1342_v2  ;;  %1169 = vmatprep.mubr.msk.bf16.mxu1 %vm1343_vm0, %v1342_v2 }
 0x129   :  { %1154 = vmatpush3.bf16.msra.mxu1 %v1271_v50 }
 0x12a   :  { %1155 = vmatprep.subr.bf16.mxu1 %v1342_v2 }
 0x12b   :  { %1136 = vmatpush3.bf16.msra.mxu0 %v1264_v43 }
 0x12c   :  { %1137 = vmatprep.subr.bf16.mxu0 %v1342_v2 }
 0x12d   :  { %1156 = vmatpush3.bf16.msra.mxu1 %v1272_v51 }
 0x12e   :  { %1157 = vmatprep.subr.bf16.mxu1 %v1342_v2 }
 0x12f   :  { %1138 = vmatpush3.bf16.msra.mxu0 %v1265_v44 }
 0x130   :  { %1139 = vmatprep.subr.bf16.mxu0 %v1342_v2 }
 0x131   :  { %1158 = vmatpush3.bf16.msra.mxu1 %v1273_v52 }
 0x132   :  { %1159 = vmatprep.subr.bf16.mxu1 %v1342_v2 }
 0x133   :  { %1140 = vmatpush3.bf16.msra.mxu0 %v1266_v45 }
 0x134   :  { %1141 = vmatprep.subr.bf16.mxu0 %v1342_v2 }
 0x135   :  { %1160 = vmatpush3.bf16.msra.mxu1 %v1274_v53 }
 0x136   :  { %1161 = vmatprep.subr.bf16.mxu1 %v1342_v2 }
 0x137   :  { %1142 = vmatpush3.bf16.msra.mxu0 %v1267_v46 }
 0x138   :  { %1143 = vmatprep.subr.bf16.mxu0 %v1342_v2 }
 0x139   :  { %1162 = vmatpush3.bf16.msra.mxu1 %v1275_v54 }
 0x13a   :  { %1163 = vmatprep.subr.bf16.mxu1 %v1342_v2 }
 0x13b   :  { %1144 = vmatpush3.bf16.msra.mxu0 %v1268_v47 }
 0x13c   :  { %1145 = vmatprep.subr.bf16.mxu0 %v1342_v2 }
 0x13d   :  { %1164 = vmatpush3.bf16.msra.mxu1 %v1276_v55 }
 0x13e   :  { %1165 = vmatprep.subr.bf16.mxu1 %v1342_v2 }
 0x13f   :  { %1146 = vmatpush3.bf16.msra.mxu0 %v1269_v48 }
 0x140   :  { %1147 = vmatprep.subr.bf16.mxu0 %v1342_v2 }
 0x141   :  { %1166 = vmatpush3.bf16.msra.mxu1 %v1277_v13 }
 0x142   :  { %1167 = vmatprep.subr.bf16.mxu1 %v1342_v2  ;;  %v1062_v2 = vld [vmem:[%s1519_s8] ss:$0 sm:$0xff] }
 0x143   :  { %1148 = vmatpush3.bf16.msra.mxu0 %v1270_v49 }
 0x145   :  { %1168 = vmatpush3.bf16.msra.mxu1 %v1278_v14 }
 0x1f9   :  { %v1087_v56 = vpop.f32.mrb[4].mxu0  ;;  %v1109_v57 = vpop.f32.mrb[4].mxu1 }
 0x1fa   :  { %v1088_v59 = vpop.f32.mrb[5].mxu0  ;;  %v1110_v60 = vpop.f32.mrb[5].mxu1 }
 0x1fb   :  { %v1089_v61 = vadd.f32 %v1088_v59, %v1087_v56  ;;  %v1111_v62 = vadd.f32 %v1110_v60, %v1109_v57  ;;  %v1090_v63 = vpop.f32.mrb[6].mxu0  ;;  %v1112_v0 = vpop.f32.mrb[6].mxu1 }
 0x1fc   :  { %v1091_v1 = vpop.f32.mrb[7].mxu0  ;;  %v1113_v3 = vpop.f32.mrb[7].mxu1 }
 0x1fd   :  { %v679_v4 = vadd.f32 %v1089_v61, %v1020_v58  ;;  %v1092_v5 = vadd.f32 %v1091_v1, %v1090_v63  ;;  %v1114_v6 = vadd.f32 %v1113_v3, %v1112_v0 }
 0x1ff   :  { %v720_v7 = vadd.f32 %v1111_v62, %v679_v4  ;;  %v682_v8 = vadd.f32 %v1092_v5, %v1020_v58 }
 0x201   :  { %v723_v9 = vadd.f32 %v1114_v6, %v682_v8  ;;  %v726_v10 = vmax.f32 %v720_v7, 0.0 }
 0x203   :  { %v727_v11 = vmax.f32 %v723_v9, 0.0 }
 0x205   :  { %v728_v12 = vpack.c.bf16 %v727_v11, %v726_v10 }
 0x207   :  { %1150 = vmatmul.mubr.bf16.vlgmr.msra.gmra.mrb[8].mxu0 %v728_v12 }
 0x2da   :  { %v834_v16 = vpop.f32.mrb[8].mxu0 }
 0x2db   :  { %v835_v17 = vadd.f32 %v1053_v15, %v834_v16  ;;  %v1151_v18 = vpop.f32.mrb[9].mxu0 }
 0x2dc   :  { %v837_v19 = vpop.f32.mrb[10].mxu0 }
 0x2dd   :  { %v838_v20 = vadd.f32 %v1053_v15, %v837_v19  ;;  %v1152_v21 = vpop.f32.mrb[11].mxu0  ;;  %v841_v22 = vmax.f32 %v835_v17, 0.0 }
 0x2df   :  { %v842_v23 = vmax.f32 %v838_v20, 0.0 }
 0x2e1   :  { %v843_v24 = vpack.c.bf16 %v842_v23, %v841_v22 }
 0x2e3   :  { %1170 = vmatmul.mubr.bf16.vlgmr.msra.gmra.mrb[8].mxu1 %v843_v24 }
 0x3b6   :  { %v949_v25 = vpop.f32.mrb[8].mxu1 }
 0x3b7   :  { %v950_v26 = vadd.f32 %v1062_v2, %v949_v25  ;;  %v1171_v27 = vpop.f32.mrb[9].mxu1 }
 0x3b8   :  { %v952_v28 = vpop.f32.mrb[10].mxu1 }
 0x3b9   :  { %v953_v29 = vadd.f32 %v1062_v2, %v952_v28  ;;  %v1172_v30 = vpop.f32.mrb[11].mxu1  ;;  %v957_v31 = vsel %vm956_vm1, %v950_v26, -inf }
 0x3ba   :  { %958 = vmax.xlane.f32.xlu0 %v957_v31 }
 0x3bb   :  { %v960_v32 = vsel %vm956_vm1, %v953_v29, -inf }
 0x3be   :  { %961 = vmax.xlane.f32.xlu0 %v960_v32 }
 0x447   :  { %v959_v33 = vpop.xlane.xlu0 %958 }
 0x448   :  { %v963_v34 = vsub.f32 %v950_v26, %v959_v33 }
 0x44a   :  { %v965_v35 = vmul.f32 1.442695, %v963_v34 }
 0x44b   :  { %v962_v36 = vpop.xlane.xlu0 %961 }
 0x44c   :  { %1279 = vpow2.f32 %v965_v35  ;;  %v964_v37 = vsub.f32 %v953_v29, %v962_v36 }
 0x44e   :  { %v967_v38 = vmul.f32 1.442695, %v964_v37 }
 0x450   :  { %1281 = vpow2.f32 %v967_v38 }
 0x456   :  { %v1280_v39 = vpop.eup %1279 }
 0x457   :  { %v969_v40 = vsel %vm956_vm1, %v1280_v39, 0.0 }
 0x458   :  { %970 = vadd.xlane.f32.xlu1 %v969_v40 }
 0x45a   :  { %v1282_v41 = vpop.eup %1281 }
 0x45b   :  { %v972_v42 = vsel %vm956_vm1, %v1282_v41, 0.0 }
 0x45c   :  { %973 = vadd.xlane.f32.xlu1 %v972_v42 }
 0x4e5   :  { %v971_v43 = vpop.xlane.xlu1 %970 }
 0x4e6   :  { %1283 = vrcp.f32 %v971_v43 }
 0x4e9   :  { %v974_v44 = vpop.xlane.xlu1 %973 }
 0x4ea   :  { %1285 = vrcp.f32 %v974_v44 }
 0x4f0   :  { %v1284_v45 = vpop.eup %1283 }
 0x4f1   :  { %v976_v46 = vmul.f32 %v1284_v45, %v1280_v39 }
 0x4f3   :  { %979 = vst.msk [vmem:[%s1520_s9] sm:$0xff] %vm956_vm1, %v976_v46 }
 0x4f4   :  { %v1286_v47 = vpop.eup %1285 }
 0x4f5   :  { %v978_v48 = vmul.f32 %v1286_v47, %v1282_v41 }
 0x4f7   :  { %980 = vst.msk [vmem:[%s1520_s9 + $0x8] sm:$0xff] %vm956_vm1, %v978_v48 }
 0x4f8   :  { %985 = vsyncpa [#allocation3], 1 }
 0x4f9   :  { %986 = vsyncpa [#allocation5], 1 }

</bundles_post_ra>
